<compile_context>
chip_gen: v7x
topology: tpu7x:2x2x1
jax: 0.10.0
libtpu: 0.0.40
codegen_flags: <defaults>
</compile_context>

<pallas_src>
import functools
import math

import jax
import jax.numpy as jnp
from jax.experimental import pallas as pl
from jax.experimental.pallas import tpu as pltpu

# Above the 32 MiB scoped default (per the v6e tiling feedback) but below
# v7x's 64 MiB physical VMEM.  The tile guards below keep the double-buffered
# working sets comfortably under this.
_VMEM_LIMIT_BYTES = 48 * 1024 * 1024


# ----------------------------- shape helpers ------------------------------- #
def _pick_tile(dim, candidates):
    """Largest tile candidate <= dim (dim is then padded up to a multiple of
    it).  Dims smaller than every candidate use a single full-extent block."""
    for c in candidates:
        if dim >= c:
            return c
    return dim


def _seq_tile(seq_len, candidates=(512, 256, 128)):
    """Sequence tile that divides seq_len exactly (no masking needed)."""
    for c in candidates:
        if seq_len % c == 0:
            return c
    return seq_len


def _pad_axis_to(arr, axis, new_size):
    pad = new_size - arr.shape[axis]
    if pad == 0:
        return arr
    widths = [(0, 0)] * arr.ndim
    widths[axis] = (0, pad)
    return jnp.pad(arr, widths)


# ----------------- fused head-major Q/K/V projection kernel ---------------- #
def _head_proj_kernel(*refs, n_proj):
    # refs: x, w_0..w_{n-1}, b_0..b_{n-1}, o_0..o_{n-1}, acc_0..acc_{n-1}
    x_ref = refs[0]
    w_refs = refs[1:1 + n_proj]
    b_refs = refs[1 + n_proj:1 + 2 * n_proj]
    o_refs = refs[1 + 2 * n_proj:1 + 3 * n_proj]
    acc_refs = refs[1 + 3 * n_proj:]

    @pl.when(pl.program_id(2) == 0)
    def _init():
        for acc in acc_refs:
            acc[...] = jnp.zeros_like(acc)

    x = x_ref[...]                                   # (tm, tk), read once
    for w, acc in zip(w_refs, acc_refs):
        acc[...] += jnp.dot(x, w[...], preferred_element_type=jnp.float32)

    @pl.when(pl.program_id(2) == pl.num_programs(2) - 1)
    def _finalize():
        for b, o, acc in zip(b_refs, o_refs, acc_refs):
            o[...] = (acc[...] + b[...].astype(jnp.float32)).astype(o.dtype)


def pallas_head_proj(x2d, wb_list):
    """x2d: (M, K); each (w, b) is ((H, K, d_k), (H, 1, d_k)).
    Returns one head-major (H, M, d_k) array per (w, b) pair."""
    M, K = x2d.shape
    n = len(wb_list)
    H, Kw, d_k = wb_list[0][0].shape
    assert K == Kw

    tm = _pick_tile(M, (512, 256, 128))
    tk = _pick_tile(K, (1024, 512, 256, 128))
    Mp = pl.cdiv(M, tm) * tm
    Kp = pl.cdiv(K, tk) * tk
    xp = _pad_axis_to(_pad_axis_to(x2d, 0, Mp), 1, Kp)
    ws = [_pad_axis_to(w, 1, Kp) for (w, _) in wb_list]
    bs = [b for (_, b) in wb_list]

    grid = (Mp // tm, H, Kp // tk)
    x_spec = pl.BlockSpec((tm, tk), lambda i, h, k: (i, k))
    w_spec = pl.BlockSpec((pl.Squeezed(), tk, d_k), lambda i, h, k: (h, k, 0))
    b_spec = pl.BlockSpec((pl.Squeezed(), 1, d_k), lambda i, h, k: (h, 0, 0))
    o_spec = pl.BlockSpec((pl.Squeezed(), tm, d_k), lambda i, h, k: (h, i, 0))

    outs = pl.pallas_call(
        functools.partial(_head_proj_kernel, n_proj=n),
        out_shape=tuple(
            jax.ShapeDtypeStruct((H, Mp, d_k), x2d.dtype) for _ in range(n)
        ),
        grid_spec=pltpu.PrefetchScalarGridSpec(
            num_scalar_prefetch=0,
            grid=grid,
            in_specs=[x_spec] + [w_spec] * n + [b_spec] * n,
            out_specs=[o_spec] * n,
            scratch_shapes=[pltpu.VMEM((tm, d_k), jnp.float32)] * n,
        ),
        compiler_params=pltpu.CompilerParams(
            dimension_semantics=("parallel", "parallel", "arbitrary"),
            vmem_limit_bytes=_VMEM_LIMIT_BYTES,
        ),
    )(xp, *ws, *bs)
    if not isinstance(outs, (list, tuple)):
        outs = (outs,)
    if Mp != M:
        outs = tuple(o[:, :M, :] for o in outs)
    return tuple(outs)


# --------------------------- flash attention -------------------------------- #
def flash_attn_kernel(q_ref, k_ref, v_ref, o_ref, m_sc, l_sc, acc_sc,
                      *, exact_recip):
    ki = pl.program_id(3)

    @pl.when(ki == 0)
    def _init():
        m_sc[...] = jnp.full_like(m_sc, -1e30)
        l_sc[...] = jnp.zeros_like(l_sc)
        acc_sc[...] = jnp.zeros_like(acc_sc)

    # 1/sqrt(d_k) is already folded into W_q, so no in-kernel scale multiply.
    s = jax.lax.dot_general(
        q_ref[...], k_ref[...],
        dimension_numbers=(((1,), (1,)), ((), ())),   # q @ k.T, no transpose op
        preferred_element_type=jnp.float32,
    )                                                 # (t_q, t_k) f32

    m_prev = m_sc[...]
    m_new = jnp.maximum(m_prev, jnp.max(s, axis=-1, keepdims=True))
    alpha = jnp.exp(m_prev - m_new)
    p = jnp.exp(s - m_new)

    l_sc[...] = alpha * l_sc[...] + jnp.sum(p, axis=-1, keepdims=True)
    acc_sc[...] = alpha * acc_sc[...] + jnp.dot(
        p.astype(v_ref.dtype), v_ref[...], preferred_element_type=jnp.float32)
    m_sc[...] = m_new

    @pl.when(ki == pl.num_programs(3) - 1)
    def _finalize():
        if exact_recip:
            ctx = acc_sc[...] / l_sc[...]
        else:
            ctx = acc_sc[...] * pl.reciprocal(l_sc[...], approx=True)
        o_ref[...] = ctx.astype(o_ref.dtype)          # full (t_q, d_k) store


def pallas_flash_attention(q, k, v, *, exact_recip=True):
    """q: (H, B, Sq, d_k), k/v: (H, B, Sk, d_k) -> (H, B, Sq, d_k).
    Heads stay split; the head merge is folded into the output projection."""
    H, B, Sq, d_k = q.shape
    Sk = k.shape[2]
    t_q = _seq_tile(Sq)
    t_k = _seq_tile(Sk, candidates=(1024, 512, 256, 128))
    grid = (B, H, Sq // t_q, Sk // t_k)

    q_spec = pl.BlockSpec((pl.Squeezed(), pl.Squeezed(), t_q, d_k),
                          lambda b, h, qi, ki: (h, b, qi, 0))
    kv_spec = pl.BlockSpec((pl.Squeezed(), pl.Squeezed(), t_k, d_k),
                           lambda b, h, qi, ki: (h, b, ki, 0))
    o_spec = pl.BlockSpec((pl.Squeezed(), pl.Squeezed(), t_q, d_k),
                          lambda b, h, qi, ki: (h, b, qi, 0))

    return pl.pallas_call(
        functools.partial(flash_attn_kernel, exact_recip=exact_recip),
        out_shape=jax.ShapeDtypeStruct((H, B, Sq, d_k), q.dtype),
        grid_spec=pltpu.PrefetchScalarGridSpec(
            num_scalar_prefetch=0,
            grid=grid,
            in_specs=[q_spec, kv_spec, kv_spec],
            out_specs=o_spec,
            scratch_shapes=[
                pltpu.VMEM((t_q, 1), jnp.float32),    # running max
                pltpu.VMEM((t_q, 1), jnp.float32),    # running denom
                pltpu.VMEM((t_q, d_k), jnp.float32),  # running context
            ],
        ),
        compiler_params=pltpu.CompilerParams(
            dimension_semantics=("parallel", "parallel", "parallel", "arbitrary"),
            vmem_limit_bytes=_VMEM_LIMIT_BYTES,
        ),
    )(q, k, v)


# --------------- output projection with head-merge folded in ---------------- #
def out_proj_kernel(ctx_ref, w_ref, b_ref, o_ref, acc_ref):
    h = pl.program_id(2)

    @pl.when(h == 0)
    def _init():
        acc_ref[...] = jnp.zeros_like(acc_ref)

    acc_ref[...] += jnp.dot(ctx_ref[...], w_ref[...],
                            preferred_element_type=jnp.float32)

    @pl.when(h == pl.num_programs(2) - 1)
    def _finalize():
        o_ref[...] = (acc_ref[...] + b_ref[...].astype(jnp.float32)).astype(
            o_ref.dtype)


def pallas_out_proj(ctx, w, b):
    """ctx: (H, M, d_k), w: (H, d_k, D), b: (1, D) -> (M, D)."""
    H, M, d_k = ctx.shape
    D = w.shape[2]
    tm = _pick_tile(M, (512, 256, 128))
    tn = _pick_tile(D, (512, 256, 128))
    Mp = pl.cdiv(M, tm) * tm
    Np = pl.cdiv(D, tn) * tn
    ctx_p = _pad_axis_to(ctx, 1, Mp)
    w_p = _pad_axis_to(w, 2, Np)
    b_p = _pad_axis_to(b, 1, Np)

    out = pl.pallas_call(
        out_proj_kernel,
        out_shape=jax.ShapeDtypeStruct((Mp, Np), ctx.dtype),
        grid_spec=pltpu.PrefetchScalarGridSpec(
            num_scalar_prefetch=0,
            grid=(Mp // tm, Np // tn, H),
            in_specs=[
                pl.BlockSpec((pl.Squeezed(), tm, d_k), lambda i, j, h: (h, i, 0)),
                pl.BlockSpec((pl.Squeezed(), d_k, tn), lambda i, j, h: (h, 0, j)),
                pl.BlockSpec((1, tn), lambda i, j, h: (0, j)),
            ],
            out_specs=pl.BlockSpec((tm, tn), lambda i, j, h: (i, j)),
            scratch_shapes=[pltpu.VMEM((tm, tn), jnp.float32)],
        ),
        compiler_params=pltpu.CompilerParams(
            dimension_semantics=("parallel", "parallel", "arbitrary"),
            vmem_limit_bytes=_VMEM_LIMIT_BYTES,
        ),
    )(ctx_p, w_p, b_p)
    return out[:M, :D] if (Mp, Np) != (M, D) else out


# ------------------------- MultiHeadAttention ------------------------------- #
def init_mha_params(key, h, d_model, dtype=jnp.float32):
    """nn.Linear-style init: U(-1/sqrt(fan_in), 1/sqrt(fan_in)); weights stored
    as (in, out) so y = x @ w + b (== x @ W.T + b in torch)."""
    bound = 1.0 / math.sqrt(d_model)
    keys = jax.random.split(key, 8)
    params = {}
    for i, name in enumerate(("q", "k", "v", "out")):
        w = jax.random.uniform(keys[2 * i], (d_model, d_model), dtype,
                               minval=-bound, maxval=bound)
        b = jax.random.uniform(keys[2 * i + 1], (d_model,), dtype,
                               minval=-bound, maxval=bound)
        params[name] = (w, b)
    return params


def prepare_mha_params(params, h):
    """One-time repack (hoisted out of the forward path):
      * fold 1/sqrt(d_k) into W_q / b_q,
      * lay Q/K/V weights out head-major (H, d_model, d_k),
      * lay W_out out as (H, d_k, d_model) so the head merge becomes a grid
        reduction inside the output-projection kernel."""
    d_model = params["q"][0].shape[0]
    d_k = d_model // h
    scale = 1.0 / math.sqrt(d_k)

    def per_head(w, b):
        wh = w.reshape(d_model, h, d_k).transpose(1, 0, 2)   # (H, d_model, d_k)
        bh = b.reshape(h, 1, d_k)                            # (H, 1, d_k)
        return wh, bh

    wq, bq = params["q"]
    prepped = {
        "q": per_head(wq * scale, bq * scale),
        "k": per_head(*params["k"]),
        "v": per_head(*params["v"]),
        "out": (params["out"][0].reshape(h, d_k, d_model),
                params["out"][1].reshape(1, d_model)),
        "h": h, "d_k": d_k, "d_model": d_model,
    }
    return prepped


def multi_head_attention(prepped, query, key, value):
    """query/key/value: (B, S, d_model) -> (B, S, d_model).  Inference path:
    mask=None, dropout inactive (matches module defaults in eval)."""
    h, d_k, D = prepped["h"], prepped["d_k"], prepped["d_model"]
    B, Sq, _ = query.shape
    Sk = key.shape[1]

    if (query is key) and (key is value):
        # Self-attention: fused projection — x streamed once, three head-major
        # outputs written directly (no split / transpose HBM copies).
        qh, kh, vh = pallas_head_proj(
            query.reshape(B * Sq, D),
            [prepped["q"], prepped["k"], prepped["v"]],
        )
    else:
        # Cross-attention (distinct tensors): separate projections.
        (qh,) = pallas_head_proj(query.reshape(B * Sq, D), [prepped["q"]])
        (kh,) = pallas_head_proj(key.reshape(B * Sk, D), [prepped["k"]])
        (vh,) = pallas_head_proj(value.reshape(B * Sk, D), [prepped["v"]])

    # Free reshapes only (head axis is already leading — no HBM transpose).
    q4 = qh.reshape(h, B, Sq, d_k)
    k4 = kh.reshape(h, B, Sk, d_k)
    v4 = vh.reshape(h, B, Sk, d_k)

    ctx = pallas_flash_attention(q4, k4, v4)                  # (H, B, Sq, d_k)
    out = pallas_out_proj(ctx.reshape(h, B * Sq, d_k), *prepped["out"])
    return out.reshape(B, Sq, D)


# --------------------------- pure-JAX reference ----------------------------- #
def reference_mha(params, query, key, value, h):
    B, Sq, D = query.shape
    d_k = D // h
    hi = jax.lax.Precision.HIGHEST

    def project(name, x):
        w, b = params[name]
        y = jnp.dot(x, w, precision=hi) + b
        return y.reshape(x.shape[0], x.shape[1], h, d_k).transpose(0, 2, 1, 3)

    q, k, v = project("q", query), project("k", key), project("v", value)
    scores = jnp.einsum("bhqd,bhkd->bhqk", q, k, precision=hi) / math.sqrt(d_k)
    p = jax.nn.softmax(scores, axis=-1)
    x = jnp.einsum("bhqk,bhkd->bhqd", p, v, precision=hi)
    x = x.transpose(0, 2, 1, 3).reshape(B, Sq, D)
    w, b = params["out"]
    return jnp.dot(x, w, precision=hi) + b


# --------------------------------- main ------------------------------------- #
if __name__ == "__main__":
    B, S, D, H = 2, 8, 32, 4   # batch, seq, d_model, heads  (d_k = 8)

    root = jax.random.PRNGKey(0)
    k_params, k_x, k_k, k_v = jax.random.split(root, 4)
    params = init_mha_params(k_params, H, D)
    prepped = prepare_mha_params(params, H)   # one-time, hoisted out of forward

    ATOL = RTOL = 1e-2

    # Self-attention (query is key is value) -> fused-QKV path.
    x = jax.random.normal(k_x, (B, S, D), jnp.float32)
    out = jax.block_until_ready(multi_head_attention(prepped, x, x, x))
    ref = reference_mha(params, x, x, x, H)
    assert out.shape == (B, S, D)
    assert jnp.allclose(out, ref, atol=ATOL, rtol=RTOL), "self-attention mismatch"

    # Distinct query/key/value -> separate-projection path.
    key_in = jax.random.normal(k_k, (B, S, D), jnp.float32)
    val_in = jax.random.normal(k_v, (B, S, D), jnp.float32)
    out2 = jax.block_until_ready(
        multi_head_attention(prepped, x, key_in, val_in))
    ref2 = reference_mha(params, x, key_in, val_in, H)
    assert jnp.allclose(out2, ref2, atol=ATOL, rtol=RTOL), "cross-attention mismatch"

    # bf16 smoke test: the MXU-peak path on v6e/v7x (f32 accumulation inside).
    params_bf16 = jax.tree_util.tree_map(
        lambda a: a.astype(jnp.bfloat16), params)
    prepped_bf16 = prepare_mha_params(params_bf16, H)
    x_bf16 = x.astype(jnp.bfloat16)
    out_bf16 = jax.block_until_ready(
        multi_head_attention(prepped_bf16, x_bf16, x_bf16, x_bf16))
    assert out_bf16.shape == (B, S, D)
    assert jnp.allclose(out_bf16.astype(jnp.float32), ref, atol=0.1, rtol=0.1), \
        "bf16 self-attention mismatch"

    print("KERNEL_OK")
</pallas_src>

<mosaic_0001>
module attributes {stable_mosaic.version = 11 : i64} {
  func.func @_head_proj_kernel(%arg0: i32, %arg1: i32, %arg2: i32, %arg3: memref<16x32xf32, #tpu.memory_space<vmem>>, %arg4: memref<1x32x8xf32, #tpu.memory_space<vmem>>, %arg5: memref<1x32x8xf32, #tpu.memory_space<vmem>>, %arg6: memref<1x32x8xf32, #tpu.memory_space<vmem>>, %arg7: memref<1x1x8xf32, #tpu.memory_space<vmem>>, %arg8: memref<1x1x8xf32, #tpu.memory_space<vmem>>, %arg9: memref<1x1x8xf32, #tpu.memory_space<vmem>>, %arg10: memref<1x16x8xf32, #tpu.memory_space<vmem>>, %arg11: memref<1x16x8xf32, #tpu.memory_space<vmem>>, %arg12: memref<1x16x8xf32, #tpu.memory_space<vmem>>, %arg13: memref<16x8xf32, #tpu.memory_space<vmem>>, %arg14: memref<16x8xf32, #tpu.memory_space<vmem>>, %arg15: memref<16x8xf32, #tpu.memory_space<vmem>>) attributes {dimension_semantics = [#tpu.dimension_semantics<parallel>, #tpu.dimension_semantics<parallel>, #tpu.dimension_semantics<arbitrary>], iteration_bounds = array<i64: 1, 4, 1>, scalar_prefetch = 0 : i64, scratch_operands = 3 : i64, tpu.core_type = #tpu.core_type<tc>, window_params = [{transform_indices = @transform_0, window_bounds = array<i64: 16, 32>}, {transform_indices = @transform_1, window_bounds = array<i64: 1, 32, 8>}, {transform_indices = @transform_2, window_bounds = array<i64: 1, 32, 8>}, {transform_indices = @transform_3, window_bounds = array<i64: 1, 32, 8>}, {transform_indices = @transform_4, window_bounds = array<i64: 1, 1, 8>}, {transform_indices = @transform_5, window_bounds = array<i64: 1, 1, 8>}, {transform_indices = @transform_6, window_bounds = array<i64: 1, 1, 8>}, {transform_indices = @transform_7, window_bounds = array<i64: 1, 16, 8>}, {transform_indices = @transform_8, window_bounds = array<i64: 1, 16, 8>}, {transform_indices = @transform_9, window_bounds = array<i64: 1, 16, 8>}]} {
    %c0_i32 = arith.constant 0 : i32
    %0 = arith.cmpi eq, %arg2, %c0_i32 : i32
    %1 = arith.extui %0 : i1 to i32
    %c0_i32_0 = arith.constant 0 : i32
    %2 = arith.cmpi ne, %1, %c0_i32_0 : i32
    scf.if %2 {
      %cst_27 = arith.constant 0.000000e+00 : f32
      %25 = vector.broadcast %cst_27 : f32 to vector<16x8xf32>
      %c0_28 = arith.constant 0 : index
      %c0_29 = arith.constant 0 : index
      %26 = vector.load %arg13[%c0_28, %c0_29] : memref<16x8xf32, #tpu.memory_space<vmem>>, vector<16x8xf32>
      tpu.vector_store %arg13[%c0_28, %c0_29], %25 {strides = array<i32>} : memref<16x8xf32, #tpu.memory_space<vmem>>, vector<16x8xf32>,
      %cst_30 = arith.constant 0.000000e+00 : f32
      %27 = vector.broadcast %cst_30 : f32 to vector<16x8xf32>
      %c0_31 = arith.constant 0 : index
      %c0_32 = arith.constant 0 : index
      %28 = vector.load %arg14[%c0_31, %c0_32] : memref<16x8xf32, #tpu.memory_space<vmem>>, vector<16x8xf32>
      tpu.vector_store %arg14[%c0_31, %c0_32], %27 {strides = array<i32>} : memref<16x8xf32, #tpu.memory_space<vmem>>, vector<16x8xf32>,
      %cst_33 = arith.constant 0.000000e+00 : f32
      %29 = vector.broadcast %cst_33 : f32 to vector<16x8xf32>
      %c0_34 = arith.constant 0 : index
      %c0_35 = arith.constant 0 : index
      %30 = vector.load %arg15[%c0_34, %c0_35] : memref<16x8xf32, #tpu.memory_space<vmem>>, vector<16x8xf32>
      tpu.vector_store %arg15[%c0_34, %c0_35], %29 {strides = array<i32>} : memref<16x8xf32, #tpu.memory_space<vmem>>, vector<16x8xf32>,
    } else {
    }
    %c0 = arith.constant 0 : index
    %c0_1 = arith.constant 0 : index
    %3 = vector.load %arg3[%c0, %c0_1] : memref<16x32xf32, #tpu.memory_space<vmem>>, vector<16x32xf32>
    %c0_2 = arith.constant 0 : index
    %c0_3 = arith.constant 0 : index
    %4 = vector.load %arg13[%c0_2, %c0_3] : memref<16x8xf32, #tpu.memory_space<vmem>>, vector<16x8xf32>
    %c0_4 = arith.constant 0 : index
    %c0_5 = arith.constant 0 : index
    %c0_6 = arith.constant 0 : index
    %5 = vector.load %arg4[%c0_4, %c0_5, %c0_6] : memref<1x32x8xf32, #tpu.memory_space<vmem>>, vector<1x32x8xf32>
    %6 = vector.shape_cast %5 : vector<1x32x8xf32> to vector<32x8xf32>
    %cst = arith.constant dense<0.000000e+00> : vector<16x8xf32>
    %7 = tpu.matmul %3, %6, %cst {dimension_numbers = #tpu.dot_dimension_numbers<[1], [0], [0], [1], [0, 0, 1, 1], [], []>} : vector<16x32xf32>, vector<32x8xf32>, vector<16x8xf32> -> vector<16x8xf32>
    %8 = arith.addf %4, %7 : vector<16x8xf32>
    %c0_7 = arith.constant 0 : index
    %c0_8 = arith.constant 0 : index
    %9 = vector.load %arg13[%c0_7, %c0_8] : memref<16x8xf32, #tpu.memory_space<vmem>>, vector<16x8xf32>
    tpu.vector_store %arg13[%c0_7, %c0_8], %8 {strides = array<i32>} : memref<16x8xf32, #tpu.memory_space<vmem>>, vector<16x8xf32>,
    %c0_9 = arith.constant 0 : index
    %c0_10 = arith.constant 0 : index
    %10 = vector.load %arg14[%c0_9, %c0_10] : memref<16x8xf32, #tpu.memory_space<vmem>>, vector<16x8xf32>
    %c0_11 = arith.constant 0 : index
    %c0_12 = arith.constant 0 : index
    %c0_13 = arith.constant 0 : index
    %11 = vector.load %arg5[%c0_11, %c0_12, %c0_13] : memref<1x32x8xf32, #tpu.memory_space<vmem>>, vector<1x32x8xf32>
    %12 = vector.shape_cast %11 : vector<1x32x8xf32> to vector<32x8xf32>
    %cst_14 = arith.constant dense<0.000000e+00> : vector<16x8xf32>
    %13 = tpu.matmul %3, %12, %cst_14 {dimension_numbers = #tpu.dot_dimension_numbers<[1], [0], [0], [1], [0, 0, 1, 1], [], []>} : vector<16x32xf32>, vector<32x8xf32>, vector<16x8xf32> -> vector<16x8xf32>
    %14 = arith.addf %10, %13 : vector<16x8xf32>
    %c0_15 = arith.constant 0 : index
    %c0_16 = arith.constant 0 : index
    %15 = vector.load %arg14[%c0_15, %c0_16] : memref<16x8xf32, #tpu.memory_space<vmem>>, vector<16x8xf32>
    tpu.vector_store %arg14[%c0_15, %c0_16], %14 {strides = array<i32>} : memref<16x8xf32, #tpu.memory_space<vmem>>, vector<16x8xf32>,
    %c0_17 = arith.constant 0 : index
    %c0_18 = arith.constant 0 : index
    %16 = vector.load %arg15[%c0_17, %c0_18] : memref<16x8xf32, #tpu.memory_space<vmem>>, vector<16x8xf32>
    %c0_19 = arith.constant 0 : index
    %c0_20 = arith.constant 0 : index
    %c0_21 = arith.constant 0 : index
    %17 = vector.load %arg6[%c0_19, %c0_20, %c0_21] : memref<1x32x8xf32, #tpu.memory_space<vmem>>, vector<1x32x8xf32>
    %18 = vector.shape_cast %17 : vector<1x32x8xf32> to vector<32x8xf32>
    %cst_22 = arith.constant dense<0.000000e+00> : vector<16x8xf32>
    %19 = tpu.matmul %3, %18, %cst_22 {dimension_numbers = #tpu.dot_dimension_numbers<[1], [0], [0], [1], [0, 0, 1, 1], [], []>} : vector<16x32xf32>, vector<32x8xf32>, vector<16x8xf32> -> vector<16x8xf32>
    %20 = arith.addf %16, %19 : vector<16x8xf32>
    %c0_23 = arith.constant 0 : index
    %c0_24 = arith.constant 0 : index
    %21 = vector.load %arg15[%c0_23, %c0_24] : memref<16x8xf32, #tpu.memory_space<vmem>>, vector<16x8xf32>
    tpu.vector_store %arg15[%c0_23, %c0_24], %20 {strides = array<i32>} : memref<16x8xf32, #tpu.memory_space<vmem>>, vector<16x8xf32>,
    %c0_i32_25 = arith.constant 0 : i32
    %22 = arith.cmpi eq, %arg2, %c0_i32_25 : i32
    %23 = arith.extui %22 : i1 to i32
    %c0_i32_26 = arith.constant 0 : i32
    %24 = arith.cmpi ne, %23, %c0_i32_26 : i32
    scf.if %24 {
      %c0_27 = arith.constant 0 : index
      %c0_28 = arith.constant 0 : index
      %25 = vector.load %arg13[%c0_27, %c0_28] : memref<16x8xf32, #tpu.memory_space<vmem>>, vector<16x8xf32>
      %c0_29 = arith.constant 0 : index
      %c0_30 = arith.constant 0 : index
      %c0_31 = arith.constant 0 : index
      %26 = vector.load %arg7[%c0_29, %c0_30, %c0_31] : memref<1x1x8xf32, #tpu.memory_space<vmem>>, vector<1x1x8xf32>
      %27 = vector.shape_cast %26 : vector<1x1x8xf32> to vector<1x8xf32>
      %28 = vector.broadcast %27 : vector<1x8xf32> to vector<16x8xf32>
      %29 = arith.addf %25, %28 : vector<16x8xf32>
      %c0_32 = arith.constant 0 : index
      %c0_33 = arith.constant 0 : index
      %c0_34 = arith.constant 0 : index
      %30 = vector.load %arg10[%c0_32, %c0_33, %c0_34] : memref<1x16x8xf32, #tpu.memory_space<vmem>>, vector<1x16x8xf32>
      %31 = vector.shape_cast %30 : vector<1x16x8xf32> to vector<16x8xf32>
      %32 = vector.shape_cast %29 : vector<16x8xf32> to vector<1x16x8xf32>
      tpu.vector_store %arg10[%c0_32, %c0_33, %c0_34], %32 {strides = array<i32>} : memref<1x16x8xf32, #tpu.memory_space<vmem>>, vector<1x16x8xf32>,
      %c0_35 = arith.constant 0 : index
      %c0_36 = arith.constant 0 : index
      %33 = vector.load %arg14[%c0_35, %c0_36] : memref<16x8xf32, #tpu.memory_space<vmem>>, vector<16x8xf32>
      %c0_37 = arith.constant 0 : index
      %c0_38 = arith.constant 0 : index
      %c0_39 = arith.constant 0 : index
      %34 = vector.load %arg8[%c0_37, %c0_38, %c0_39] : memref<1x1x8xf32, #tpu.memory_space<vmem>>, vector<1x1x8xf32>
      %35 = vector.shape_cast %34 : vector<1x1x8xf32> to vector<1x8xf32>
      %36 = vector.broadcast %35 : vector<1x8xf32> to vector<16x8xf32>
      %37 = arith.addf %33, %36 : vector<16x8xf32>
      %c0_40 = arith.constant 0 : index
      %c0_41 = arith.constant 0 : index
      %c0_42 = arith.constant 0 : index
      %38 = vector.load %arg11[%c0_40, %c0_41, %c0_42] : memref<1x16x8xf32, #tpu.memory_space<vmem>>, vector<1x16x8xf32>
      %39 = vector.shape_cast %38 : vector<1x16x8xf32> to vector<16x8xf32>
      %40 = vector.shape_cast %37 : vector<16x8xf32> to vector<1x16x8xf32>
      tpu.vector_store %arg11[%c0_40, %c0_41, %c0_42], %40 {strides = array<i32>} : memref<1x16x8xf32, #tpu.memory_space<vmem>>, vector<1x16x8xf32>,
      %c0_43 = arith.constant 0 : index
      %c0_44 = arith.constant 0 : index
      %41 = vector.load %arg15[%c0_43, %c0_44] : memref<16x8xf32, #tpu.memory_space<vmem>>, vector<16x8xf32>
      %c0_45 = arith.constant 0 : index
      %c0_46 = arith.constant 0 : index
      %c0_47 = arith.constant 0 : index
      %42 = vector.load %arg9[%c0_45, %c0_46, %c0_47] : memref<1x1x8xf32, #tpu.memory_space<vmem>>, vector<1x1x8xf32>
      %43 = vector.shape_cast %42 : vector<1x1x8xf32> to vector<1x8xf32>
      %44 = vector.broadcast %43 : vector<1x8xf32> to vector<16x8xf32>
      %45 = arith.addf %41, %44 : vector<16x8xf32>
      %c0_48 = arith.constant 0 : index
      %c0_49 = arith.constant 0 : index
      %c0_50 = arith.constant 0 : index
      %46 = vector.load %arg12[%c0_48, %c0_49, %c0_50] : memref<1x16x8xf32, #tpu.memory_space<vmem>>, vector<1x16x8xf32>
      %47 = vector.shape_cast %46 : vector<1x16x8xf32> to vector<16x8xf32>
      %48 = vector.shape_cast %45 : vector<16x8xf32> to vector<1x16x8xf32>
      tpu.vector_store %arg12[%c0_48, %c0_49, %c0_50], %48 {strides = array<i32>} : memref<1x16x8xf32, #tpu.memory_space<vmem>>, vector<1x16x8xf32>,
    } else {
    }
    return
  }
  func.func @transform_0(%arg0: i32, %arg1: i32, %arg2: i32) -> (i32, i32) {
    %c0_i32 = arith.constant 0 : i32
    return %arg0, %arg2 : i32, i32
  }
  func.func @transform_1(%arg0: i32, %arg1: i32, %arg2: i32) -> (i32, i32, i32) {
    %c0_i32 = arith.constant 0 : i32
    %c0_i32_0 = arith.constant 0 : i32
    return %arg1, %arg2, %c0_i32 : i32, i32, i32
  }
  func.func @transform_2(%arg0: i32, %arg1: i32, %arg2: i32) -> (i32, i32, i32) {
    %c0_i32 = arith.constant 0 : i32
    %c0_i32_0 = arith.constant 0 : i32
    return %arg1, %arg2, %c0_i32 : i32, i32, i32
  }
  func.func @transform_3(%arg0: i32, %arg1: i32, %arg2: i32) -> (i32, i32, i32) {
    %c0_i32 = arith.constant 0 : i32
    %c0_i32_0 = arith.constant 0 : i32
    return %arg1, %arg2, %c0_i32 : i32, i32, i32
  }
  func.func @transform_4(%arg0: i32, %arg1: i32, %arg2: i32) -> (i32, i32, i32) {
    %c0_i32 = arith.constant 0 : i32
    %c0_i32_0 = arith.constant 0 : i32
    %c0_i32_1 = arith.constant 0 : i32
    return %arg1, %c0_i32, %c0_i32_0 : i32, i32, i32
  }
  func.func @transform_5(%arg0: i32, %arg1: i32, %arg2: i32) -> (i32, i32, i32) {
    %c0_i32 = arith.constant 0 : i32
    %c0_i32_0 = arith.constant 0 : i32
    %c0_i32_1 = arith.constant 0 : i32
    return %arg1, %c0_i32, %c0_i32_0 : i32, i32, i32
  }
  func.func @transform_6(%arg0: i32, %arg1: i32, %arg2: i32) -> (i32, i32, i32) {
    %c0_i32 = arith.constant 0 : i32
    %c0_i32_0 = arith.constant 0 : i32
    %c0_i32_1 = arith.constant 0 : i32
    return %arg1, %c0_i32, %c0_i32_0 : i32, i32, i32
  }
  func.func @transform_7(%arg0: i32, %arg1: i32, %arg2: i32) -> (i32, i32, i32) {
    %c0_i32 = arith.constant 0 : i32
    %c0_i32_0 = arith.constant 0 : i32
    return %arg1, %arg0, %c0_i32 : i32, i32, i32
  }
  func.func @transform_8(%arg0: i32, %arg1: i32, %arg2: i32) -> (i32, i32, i32) {
    %c0_i32 = arith.constant 0 : i32
    %c0_i32_0 = arith.constant 0 : i32
    return %arg1, %arg0, %c0_i32 : i32, i32, i32
  }
  func.func @transform_9(%arg0: i32, %arg1: i32, %arg2: i32) -> (i32, i32, i32) {
    %c0_i32 = arith.constant 0 : i32
    %c0_i32_0 = arith.constant 0 : i32
    return %arg1, %arg0, %c0_i32 : i32, i32, i32
  }
}

</mosaic_0001>

<bundles_post_ra>
// kernel: tpu_custom_call.1
= control target key start
LH: loop header
LB: loop body
LE: loop exit
PB: predicated region body
PF: predicated region fallthrough
CT: control target
= control target key end

     0   :  { %s1372_s30 = smov 0   ;;  %s1374_s10 = smov 0   ;;  %s1463_s0 = inlined_call_operand.vmem [shape: f32[16,32], index: 0, kind: input, shape index: {}]   ;;  %s1464_s1 = inlined_call_operand.vmem [shape: f32[4,32,8], index: 1, kind: input, shape index: {}]   ;;  %s1465_s2 = inlined_call_operand.vmem [shape: f32[4,32,8], index: 2, kind: input, shape index: {}]   ;;  %s1466_s3 = inlined_call_operand.vmem [shape: f32[4,32,8], index: 3, kind: input, shape index: {}]   ;;  %s1467_s4 = inlined_call_operand.vmem [shape: f32[4,1,8], index: 4, kind: input, shape index: {}]   ;;  %s1468_s5 = inlined_call_operand.vmem [shape: f32[4,1,8], index: 5, kind: input, shape index: {}]   ;;  %s1469_s6 = inlined_call_operand.vmem [shape: f32[4,1,8], index: 6, kind: input, shape index: {}]   ;;  %s1470_s7 = inlined_call_operand.vmem [shape: f32[4,16,8], index: 7, kind: output, shape index: {0}]   ;;  %s1471_s8 = inlined_call_operand.vmem [shape: f32[4,16,8], index: 8, kind: output, shape index: {1}]   ;;  %s1472_s9 = inlined_call_operand.vmem [shape: f32[4,16,8], index: 9, kind: output, shape index: {2}]  }
   0x1   :  { %s1376_s11 = smov 0  }
   0x2 LB: > { %s35_s12 = sadd.s32 1, %s1315_s10  ;;  %p1167_p0 = scmp.ge.s32.totalorder %s1319_s11, 1  ;;  %s1319_s11 = sphi %s1376_s11, %s20_s11   ;;  %s1315_s10 = sphi %s1374_s10, %s1474_s10   ;;  %s1311_s30 = sphi %s1372_s30, %s1473_s30  }
   0x3   : > { %p37_p1 = scmp.ge.s32.totalorder %s35_s12, 4  ;;  %p398_p2 = scmp.lt.s32.totalorder %s1319_s11, 5 }
   0x5   : > { %s1476_s12 = smov (%p37_p1, %s35_s12), 0  ;;  %p399_p3 = pnand %p1167_p0, %p398_p2 }
   0x6   : > { %p505_p4 = scmp.lt.s32.totalorder (!%p399_p3), %s1311_s30, 3  ;;  %v584_v0 = vld [vmem:[%s1463_s0] sm:$0xff] (!%p399_p3)  ;;  %vm592_vm0 = vcmask (!%p399_p3), 261120   ;;  %vm577_vm1 = vcmask (!%p399_p3), 64512   ;;  %v1321_v1 = vmov (!%p399_p3), 0.0   ;;  %v585_v19 = vld [vmem:[%s1463_s0 + $0x8] sm:$0xff] (!%p399_p3) }
   0x7   : > { %402 = sbr.rel (%p399_p3) target bundleno = 262 (0x106), region = 48  ;;  %1223 = vmatprep.mubr.msk.f32.mxu0 (!%p399_p3), %vm592_vm0, %v584_v0  ;;  %1234 = vmatprep.mubr.msk.f32.mxu1 (!%p399_p3), %vm592_vm0, %v584_v0  ;;  %579 = vst.msk [vmem:[#allocation2 + $0x8] sm:$0xff] (!%p399_p3), %vm577_vm1, %v1321_v1  ;;  %578 = vst.msk [vmem:[#allocation2] sm:$0xff] (!%p399_p3), %vm577_vm1, %v1321_v1 }
   0x8   : > { %580 = vst.msk [vmem:[#allocation3] sm:$0xff] (!%p399_p3), %vm577_vm1, %v1321_v1  ;;  %581 = vst.msk [vmem:[#allocation3 + $0x8] sm:$0xff] (!%p399_p3), %vm577_vm1, %v1321_v1 }
   0x9   : > { %582 = vst.msk [vmem:[#allocation4] sm:$0xff] (!%p399_p3), %vm577_vm1, %v1321_v1  ;;  %583 = vst.msk [vmem:[#allocation4 + $0x8] sm:$0xff] (!%p399_p3), %vm577_vm1, %v1321_v1 }
   0xe   : > { %s1478_s30 = smov (!%p505_p4, %s1311_s30), 3  ;;  %v587_v21 = vld [vmem:[#allocation2 + $0x8] sm:$0xff]  ;;  %v586_v22 = vld [vmem:[#allocation2] sm:$0xff] }
   0xf   : > { %s1191_s15 = sshll.u32 %s1478_s30, 5  ;;  %v680_v26 = vld [vmem:[#allocation3 + $0x8] sm:$0xff]  ;;  %v679_v28 = vld [vmem:[#allocation3] sm:$0xff]  ;;  %s536_s29 = scalar_lea.vmem %s1467_s4, %s1478_s30 }
  0x10   : > { %s512_s18 = scalar_lea.vmem %s1464_s1, %s1191_s15  ;;  %s522_s21 = scalar_lea.vmem %s1465_s2, %s1191_s15  ;;  %v765_v33 = vld [vmem:[#allocation4 + $0x8] sm:$0xff]  ;;  %v764_v34 = vld [vmem:[#allocation4] sm:$0xff] }
  0x11   : > { %v588_v2 = vld [vmem:[%s512_s18] sm:$0xff]  ;;  %v589_v3 = vld [vmem:[%s512_s18 + $0x8] sm:$0xff]  ;;  %v590_v5 = vld [vmem:[%s512_s18 + $0x10] sm:$0xff]  ;;  %s532_s24 = scalar_lea.vmem %s1466_s3, %s1191_s15  ;;  %s1194_s13 = sshll.u32 %s1478_s30, 4 }
  0x12   : > { %v1248_v4 = vpack.c.bf16 %v589_v3, %v588_v2  ;;  %v591_v6 = vld [vmem:[%s512_s18 + $0x18] sm:$0xff]  ;;  %v681_v8 = vld [vmem:[%s522_s21] sm:$0xff]  ;;  %v682_v9 = vld [vmem:[%s522_s21 + $0x8] sm:$0xff]  ;;  %s539_s16 = scalar_lea.vmem %s1468_s5, %s1478_s30  ;;  %s551_s19 = scalar_lea.vmem %s1470_s7, %s1194_s13 }
  0x13   : > { %v1252_v7 = vpack.c.bf16 %v591_v6, %v590_v5  ;;  %v683_v10 = vld [vmem:[%s522_s21 + $0x10] sm:$0xff]  ;;  %v1256_v11 = vpack.c.bf16 %v682_v9, %v681_v8  ;;  %v766_v12 = vld [vmem:[%s532_s24] sm:$0xff]  ;;  %v767_v13 = vld [vmem:[%s532_s24 + $0x8] sm:$0xff]  ;;  %s542_s22 = scalar_lea.vmem %s1469_s6, %s1478_s30  ;;  %s561_s25 = scalar_lea.vmem %s1471_s8, %s1194_s13 }
  0x14   : > { %1249 = vmatprep.subr.bf16.mxu0 %v1248_v4  ;;  %v684_v14 = vld [vmem:[%s522_s21 + $0x18] sm:$0xff]  ;;  %v1264_v15 = vpack.c.bf16 %v767_v13, %v766_v12  ;;  %v768_v17 = vld [vmem:[%s532_s24 + $0x10] sm:$0xff]  ;;  %v1186_v35 = vld [vmem:[%s536_s29] ss:$0 sm:$0xff]  ;;  %s571_s30 = scalar_lea.vmem %s1472_s9, %s1194_s13 }
  0x15   : > { %1251 = vmatpush3.bf16.msra.mxu0 %v1248_v4  ;;  %v1260_v16 = vpack.c.bf16 %v684_v14, %v683_v10  ;;  %1257 = vmatprep.subr.bf16.mxu1 %v1256_v11  ;;  %v769_v18 = vld [vmem:[%s532_s24 + $0x18] sm:$0xff]  ;;  %v1187_v41 = vld [vmem:[%s539_s16] ss:$0 sm:$0xff] }
  0x16   : > { %1253 = vmatprep.subr.bf16.mxu0 %v1252_v7  ;;  %1259 = vmatpush3.bf16.msra.mxu1 %v1256_v11  ;;  %v1268_v20 = vpack.c.bf16 %v769_v18, %v768_v17  ;;  %v1188_v49 = vld [vmem:[%s542_s22] ss:$0 sm:$0xff] }
  0x17   : > { %1261 = vmatprep.subr.bf16.mxu1 %v1260_v16 }
  0x19   : > { %1255 = vmatpush3.bf16.msra.mxu0 %v1252_v7 }
  0x1a   : > { %1265 = vmatprep.subr.bf16.mxu0 %v1264_v15  ;;  %1263 = vmatpush3.bf16.msra.mxu1 %v1260_v16 }
  0x1c   : > { %1224 = vmatmul.mubr.msk.f32.vlgmr.msra.gmra.mrb[0].mxu0 %vm592_vm0, %v585_v19 }
  0x1d   : > { %1267 = vmatpush3.bf16.msra.mxu0 %v1264_v15  ;;  %1245 = vmatprep.mubr.msk.f32.mxu0 %vm592_vm0, %v584_v0 }
  0x1e   : > { %1269 = vmatprep.subr.bf16.mxu0 %v1268_v20  ;;  %1235 = vmatmul.mubr.msk.f32.vlgmr.msra.gmra.mrb[0].mxu1 %vm592_vm0, %v585_v19 }
  0x21   : > { %1271 = vmatpush3.bf16.msra.mxu0 %v1268_v20 }
  0x24   : > { %1246 = vmatmul.mubr.msk.f32.vlgmr.msra.gmra.mrb[2].mxu0 %vm592_vm0, %v585_v19 }
  0xef   : > { %v1225_v23 = vpop.f32.mrb[0].mxu0 }
  0xf0   : > { %v675_v24 = vadd.f32 %v1225_v23, %v587_v21  ;;  %v665_v25 = vpop.f32.mrb[1].mxu0 }
  0xf1   : > { %v674_v27 = vadd.f32 %v665_v25, %v586_v22  ;;  %v1236_v29 = vpop.f32.mrb[0].mxu1 }
  0xf2   : > { %678 = vst.msk [vmem:[#allocation2 + $0x8] sm:$0xff] %vm577_vm1, %v675_v24  ;;  %v761_v30 = vadd.f32 %v1236_v29, %v680_v26  ;;  %v751_v31 = vpop.f32.mrb[1].mxu1 }
  0xf3   : > { %677 = vst.msk [vmem:[#allocation2] sm:$0xff] %vm577_vm1, %v674_v27  ;;  %v760_v32 = vadd.f32 %v751_v31, %v679_v28 }
  0xf4   : > { %763 = vst.msk [vmem:[#allocation3 + $0x8] sm:$0xff] %vm577_vm1, %v761_v30 }
  0xf5   : > { %762 = vst.msk [vmem:[#allocation3] sm:$0xff] %vm577_vm1, %v760_v32 }
  0xf7   : > { %v1247_v36 = vpop.f32.mrb[2].mxu0 }
  0xf8   : > { %v846_v37 = vadd.f32 %v1247_v36, %v765_v33  ;;  %v836_v38 = vpop.f32.mrb[3].mxu0 }
  0xf9   : > { %v853_v39 = vld [vmem:[#allocation2 + $0x8] sm:$0xff]  ;;  %v845_v40 = vadd.f32 %v836_v38, %v764_v34 }
  0xfa   : > { %v862_v42 = vadd.f32 %v1186_v35, %v853_v39  ;;  %v852_v43 = vld [vmem:[#allocation2] sm:$0xff]  ;;  %848 = vst.msk [vmem:[#allocation4 + $0x8] sm:$0xff] %vm577_vm1, %v846_v37 }
  0xfb   : > { %v861_v44 = vadd.f32 %v1186_v35, %v852_v43  ;;  %847 = vst.msk [vmem:[#allocation4] sm:$0xff] %vm577_vm1, %v845_v40  ;;  %v866_v45 = vld [vmem:[#allocation3 + $0x8] sm:$0xff] }
  0xfc   : > { %864 = vst.msk [vmem:[%s551_s19 + $0x8] sm:$0xff] %vm577_vm1, %v862_v42  ;;  %v875_v46 = vadd.f32 %v1187_v41, %v866_v45  ;;  %v865_v47 = vld [vmem:[#allocation3] sm:$0xff] }
  0xfd   : > { %863 = vst.msk [vmem:[%s551_s19] sm:$0xff] %vm577_vm1, %v861_v44  ;;  %v874_v48 = vadd.f32 %v1187_v41, %v865_v47 }
  0xfe   : > { %877 = vst.msk [vmem:[%s561_s25 + $0x8] sm:$0xff] %vm577_vm1, %v875_v46 }
  0xff   : > { %876 = vst.msk [vmem:[%s561_s25] sm:$0xff] %vm577_vm1, %v874_v48 }
 0x101   : > { %v879_v50 = vld [vmem:[#allocation4 + $0x8] sm:$0xff] }
 0x102   : > { %v888_v51 = vadd.f32 %v1188_v49, %v879_v50  ;;  %v878_v52 = vld [vmem:[#allocation4] sm:$0xff] }
 0x103   : > { %v887_v53 = vadd.f32 %v1188_v49, %v878_v52 }
 0x104   : > { %890 = vst.msk [vmem:[%s571_s30 + $0x8] sm:$0xff] %vm577_vm1, %v888_v51 }
 0x105   : > { %889 = vst.msk [vmem:[%s571_s30] sm:$0xff] %vm577_vm1, %v887_v53 }
 0x106 PF: > { %s20_s11 = sadd.s32 1, %s1319_s11   ;;  %s1473_s30 = smov %s1315_s10 }
 0x107   : > { %p17_p5 = scmp.ge.s32.totalorder %s20_s11, 6   ;;  %s1474_s10 = smov %s1476_s12 }
 0x109   :  { %19 = sbr.rel (!%p17_p5) target bundleno = 2 (0x2), region = 128 }

</bundles_post_ra>
